<compile_context>
chip_gen: v5e
topology: v5e:2x2
jax: 0.10.0
libtpu: 0.0.40
codegen_flags: <defaults>
</compile_context>

<pallas_src>
import math

import jax
import jax.numpy as jnp
from jax.experimental import pallas as pl
from jax.experimental.pallas import tpu as pltpu

LN_EPS = 1e-5  # torch.nn.LayerNorm default


def _patch_merging_kernel(x_ref, we_ref, wo_ref, bias_ref, colsum_ref, o_ref):
    # x_ref      : (TB, 2, W2, 2C) one contiguous HBM slab per grid step;
    #              axis 1 = H-parity, last axis = [w-even C | w-odd C].
    # we_ref     : (2C, C2p) gamma-folded weight rows for the even-H slab.
    # wo_ref     : (2C, C2p) gamma-folded weight rows for the odd-H slab.
    # bias_ref   : (1, C2p)  beta @ W.
    # colsum_ref : (1, C2p)  column sums of the gamma-folded weight (mean term).
    # o_ref      : (TB*W2, C2p)
    tb, _, w2, c2 = x_ref.shape
    rows = tb * w2

    # NOTE: merging (TB, W2) -> rows is a free relayout when W2 % sublane == 0;
    # otherwise it is a small VMEM-local repack hidden under the HBM DMA of this
    # memory-bound kernel (a 3-D dot_general would avoid it but is not reliably
    # lowerable by Mosaic).
    xe = x_ref[:, 0].reshape(rows, c2)
    xo = x_ref[:, 1].reshape(rows, c2)

    # One-pass moments over the full 4C feature vector (permutation invariant,
    # so the [x0|x2]/[x1|x3] channel split does not matter here).
    xe32 = xe.astype(jnp.float32)
    xo32 = xo.astype(jnp.float32)
    inv_c4 = 1.0 / (2.0 * c2)
    s1 = jnp.sum(xe32, axis=-1, keepdims=True) + jnp.sum(xo32, axis=-1, keepdims=True)
    s2 = (jnp.sum(xe32 * xe32, axis=-1, keepdims=True)
          + jnp.sum(xo32 * xo32, axis=-1, keepdims=True))
    mean = s1 * inv_c4
    var = jnp.maximum(s2 * inv_c4 - mean * mean, 0.0)
    inv_std = jax.lax.rsqrt(var + LN_EPS)

    # Raw-input matmuls (MXU) + post-matmul affine that realizes the LayerNorm.
    acc = jnp.dot(xe.astype(we_ref.dtype), we_ref[...],
                  preferred_element_type=jnp.float32)
    acc = acc + jnp.dot(xo.astype(wo_ref.dtype), wo_ref[...],
                        preferred_element_type=jnp.float32)
    out = (acc - mean * colsum_ref[...]) * inv_std + bias_ref[...]
    o_ref[...] = out.astype(o_ref.dtype)


def _vmem_info():
    """(budget, vmem_limit_bytes) — generation-aware, conservative fallback."""
    try:
        phys = int(getattr(pltpu.get_tpu_info(), "vmem_capacity_bytes"))
        if phys <= 0:
            raise ValueError(phys)
    except Exception:
        phys = 64 * 1024 * 1024  # fits every generation (v7x = 64 MiB per TC)
    return (phys * 7) // 10, (phys * 4) // 5


def _pick_tb(bdh2, w2, q, tb_vmem, target_rows=1024, min_steps=8):
    """Block of the B*D*H2 axis.  The grid is cdiv(bdh2, tb) with a masked
    partial last block, so tb never has to divide bdh2.  tb is a multiple of q
    so the 2-D output block rows (tb*w2) stay sublane-aligned."""
    cdiv = lambda a, b: -(-a // b)
    dn = lambda v: max(q, (v // q) * q)
    if bdh2 <= q:
        return bdh2                      # single full-extent block (always legal)
    tb = dn(min(max(1, target_rows // w2), max(q, tb_vmem)))
    if tb >= bdh2:
        tb = dn(cdiv(bdh2, 2))           # >=2 steps so both v7x TCs get work
        if tb >= bdh2:
            return bdh2
    steps = cdiv(bdh2, tb)
    if steps < min_steps and bdh2 // q >= min_steps:
        tb = dn(cdiv(bdh2, min_steps))   # deepen the pipeline / hide the ramp
        steps = cdiv(bdh2, tb)
    if steps > 1 and steps % 2:
        t2 = dn(cdiv(bdh2, steps + 1))   # prefer an even step count (2 TCs)
        if cdiv(bdh2, t2) % 2 == 0:
            tb = t2
    return tb


def patch_merging(x, gamma, beta, w_reduction, *, out_dtype=None, mxu_dtype=None,
                  target_rows=1024):
    """x: (B, D, H, W, C).  gamma/beta: (4C,).  w_reduction: (4C, 2C), i.e. the
    transpose of nn.Linear(4*dim, 2*dim, bias=False).weight.
    Returns (B, D, ceil(H/2), ceil(W/2), 2C)."""
    B, D, H, W, C = x.shape
    C4, C2 = w_reduction.shape
    assert C4 == 4 * C, (C4, C)
    out_dtype = x.dtype if out_dtype is None else out_dtype
    if mxu_dtype is None:
        # bf16 inputs feed the MXU directly (native on v6e/v7x); keep f32
        # operands for f32 inputs to preserve reference-level accuracy.
        mxu_dtype = jnp.bfloat16 if x.dtype == jnp.bfloat16 else jnp.float32

    # ---- pad odd spatial dims (matches F.pad(x, (0,0, 0,W%2, 0,H%2))) -------
    pad_h, pad_w = H % 2, W % 2
    if pad_h or pad_w:
        # TODO(synk): the (rare) odd-H/W case still pays one full HBM copy here;
        # a masked tail block could avoid it.
        x = jnp.pad(x, ((0, 0), (0, 0), (0, pad_h), (0, pad_w), (0, 0)))
    H2, W2 = (H + pad_h) // 2, (W + pad_w) // 2

    # ---- free contiguous view: (B*D*H2, 2, W2, 2C); one contiguous DMA per
    # block fetches both H-parities.  Last axis is [w-even C | w-odd C]. -------
    BDH2 = B * D * H2
    xr = x.reshape(BDH2, 2, W2, 2 * C)

    # ---- fold the LayerNorm affine + normalization through the linear -------
    wf = w_reduction.astype(jnp.float32)                       # (4C, 2C)
    wg = gamma.astype(jnp.float32)[:, None] * wf               # gamma fold
    bias = beta.astype(jnp.float32)[None, :] @ wf              # (1, 2C) beta fold
    colsum = jnp.sum(wg, axis=0, keepdims=True)                # (1, 2C) mean term
    # torch concat order [x0,x1,x2,x3] = [(he,we),(ho,we),(he,wo),(ho,wo)];
    # the kernel sees [x0|x2] (even-H slab) and [x1|x3] (odd-H slab).
    w_e = jnp.concatenate([wg[0:C], wg[2 * C:3 * C]], axis=0)      # (2C, C2)
    w_o = jnp.concatenate([wg[C:2 * C], wg[3 * C:4 * C]], axis=0)  # (2C, C2)

    # ---- always lane-dense output: pad columns up to a multiple of 128 ------
    pad_cols = (-C2) % 128
    C2p = C2 + pad_cols
    if pad_cols:
        w_e = jnp.pad(w_e, ((0, 0), (0, pad_cols)))
        w_o = jnp.pad(w_o, ((0, 0), (0, pad_cols)))
        bias = jnp.pad(bias, ((0, 0), (0, pad_cols)))
        colsum = jnp.pad(colsum, ((0, 0), (0, pad_cols)))
    w_e = w_e.astype(mxu_dtype)
    w_o = w_o.astype(mxu_dtype)

    # ---- dtype- and generation-aware block sizing ----------------------------
    in_isz = jnp.dtype(x.dtype).itemsize
    out_isz = jnp.dtype(out_dtype).itemsize
    mxu_isz = jnp.dtype(mxu_dtype).itemsize
    vmem_budget, vmem_limit = _vmem_info()
    sub_in = max(8, 32 // in_isz)          # sublane tile of the input dtype
    row_align = max(8, 32 // out_isz)      # sublane tile of the output dtype
    c2 = 2 * C
    w2_pad = -(-W2 // sub_in) * sub_in
    c2_pad = -(-c2 // 128) * 128
    per_tb = (2 * 2 * w2_pad * c2_pad * in_isz            # double-buffered input block
              + 2 * W2 * C2p * out_isz                    # double-buffered output block
              + W2 * (2 * c2_pad * (4 + mxu_isz) + 2 * C2p * 4))  # in-kernel temps
    fixed = 2 * 2 * c2 * C2p * mxu_isz + 2 * 2 * 8 * C2p * 4 + (2 << 20)
    tb_vmem = max(1, (vmem_budget - fixed) // per_tb)
    q = row_align // math.gcd(W2, row_align)
    TB = _pick_tb(BDH2, W2, q, tb_vmem, target_rows=target_rows)
    grid = (pl.cdiv(BDH2, TB),)
    N = BDH2 * W2

    out = pl.pallas_call(
        _patch_merging_kernel,
        out_shape=jax.ShapeDtypeStruct((N, C2p), out_dtype),
        grid_spec=pltpu.PrefetchScalarGridSpec(
            num_scalar_prefetch=0,
            grid=grid,
            in_specs=[
                # one contiguous slab per step, both H-parities
                pl.BlockSpec((TB, 2, W2, 2 * C), lambda i: (i, 0, 0, 0)),
                # TODO(synk): these operands are grid-invariant; a single-buffer
                # pipeline mode would reclaim one (small) copy of each.
                pl.BlockSpec((2 * C, C2p), lambda i: (0, 0)),
                pl.BlockSpec((2 * C, C2p), lambda i: (0, 0)),
                pl.BlockSpec((1, C2p), lambda i: (0, 0)),
                pl.BlockSpec((1, C2p), lambda i: (0, 0)),
            ],
            out_specs=pl.BlockSpec((TB * W2, C2p), lambda i: (i, 0)),
        ),
        compiler_params=pltpu.CompilerParams(
            dimension_semantics=("parallel",),
            vmem_limit_bytes=int(vmem_limit),
        ),
    )(xr, w_e, w_o, bias, colsum)

    if C2p != C2:
        out = out[:, :C2]
    return out.reshape(B, D, H2, W2, C2)


def _reference(x, gamma, beta, w_reduction):
    """Pure-JAX reference matching the PyTorch forward."""
    B, D, H, W, C = x.shape
    pad_h, pad_w = H % 2, W % 2
    if pad_h or pad_w:
        x = jnp.pad(x, ((0, 0), (0, 0), (0, pad_h), (0, pad_w), (0, 0)))
    x0 = x[:, :, 0::2, 0::2, :]
    x1 = x[:, :, 1::2, 0::2, :]
    x2 = x[:, :, 0::2, 1::2, :]
    x3 = x[:, :, 1::2, 1::2, :]
    xc = jnp.concatenate([x0, x1, x2, x3], -1).astype(jnp.float32)
    mean = jnp.mean(xc, axis=-1, keepdims=True)
    var = jnp.mean((xc - mean) ** 2, axis=-1, keepdims=True)
    xn = (xc - mean) / jnp.sqrt(var + LN_EPS) * gamma + beta
    return jnp.einsum("bdhwc,co->bdhwo", xn, w_reduction)


if __name__ == "__main__":
    # Small shapes implied by the module: dim = C = 16, spatial 8x8, depth 2.
    B, D, H, W, C = 2, 2, 8, 8, 16
    key = jax.random.PRNGKey(0)
    kx, kw, kg, kb = jax.random.split(key, 4)

    x = jax.random.normal(kx, (B, D, H, W, C), dtype=jnp.float32)
    # nn.Linear(4*dim, 2*dim, bias=False).weight has shape (2*dim, 4*dim);
    # we store its transpose so the kernel computes x @ W.
    w_reduction = jax.random.normal(kw, (4 * C, 2 * C), dtype=jnp.float32) * 0.05
    gamma = 1.0 + 0.1 * jax.random.normal(kg, (4 * C,), dtype=jnp.float32)
    beta = 0.1 * jax.random.normal(kb, (4 * C,), dtype=jnp.float32)

    out = jax.block_until_ready(patch_merging(x, gamma, beta, w_reduction))
    ref = _reference(x, gamma, beta, w_reduction)
    assert out.shape == (B, D, H // 2, W // 2, 2 * C), out.shape
    err = float(jnp.max(jnp.abs(out - ref)))
    assert jnp.allclose(out, ref, atol=1e-3, rtol=1e-3), err

    # Odd-H/W padding path.
    x_odd = jax.random.normal(kx, (1, 2, 7, 7, C), dtype=jnp.float32)
    out_odd = jax.block_until_ready(patch_merging(x_odd, gamma, beta, w_reduction))
    ref_odd = _reference(x_odd, gamma, beta, w_reduction)
    assert out_odd.shape == (1, 2, 4, 4, 2 * C), out_odd.shape
    err_odd = float(jnp.max(jnp.abs(out_odd - ref_odd)))
    assert jnp.allclose(out_odd, ref_odd, atol=1e-3, rtol=1e-3), err_odd

    # Non-divisible B*D*H2 -> cdiv grid with a masked partial last block.
    x_rag = jax.random.normal(kx, (1, 3, 10, 12, C), dtype=jnp.float32)
    out_rag = jax.block_until_ready(patch_merging(x_rag, gamma, beta, w_reduction))
    ref_rag = _reference(x_rag, gamma, beta, w_reduction)
    assert out_rag.shape == (1, 3, 5, 6, 2 * C), out_rag.shape
    err_rag = float(jnp.max(jnp.abs(out_rag - ref_rag)))
    assert jnp.allclose(out_rag, ref_rag, atol=1e-3, rtol=1e-3), err_rag

    print("KERNEL_OK")
</pallas_src>

<mosaic_0001>
module attributes {stable_mosaic.version = 11 : i64} {
  func.func @_patch_merging_kernel(%arg0: i32, %arg1: memref<2x2x4x32xf32, #tpu.memory_space<vmem>>, %arg2: memref<32x128xf32, #tpu.memory_space<vmem>>, %arg3: memref<32x128xf32, #tpu.memory_space<vmem>>, %arg4: memref<1x128xf32, #tpu.memory_space<vmem>>, %arg5: memref<1x128xf32, #tpu.memory_space<vmem>>, %arg6: memref<8x128xf32, #tpu.memory_space<vmem>>) attributes {dimension_semantics = [#tpu.dimension_semantics<parallel>], iteration_bounds = array<i64: 8>, scalar_prefetch = 0 : i64, scratch_operands = 0 : i64, tpu.core_type = #tpu.core_type<tc>, window_params = [{transform_indices = @transform_0, window_bounds = array<i64: 2, 2, 4, 32>}, {pipeline_mode = #tpu.pipeline_mode<synchronous>, transform_indices = @transform_1, window_bounds = array<i64: 32, 128>}, {pipeline_mode = #tpu.pipeline_mode<synchronous>, transform_indices = @transform_2, window_bounds = array<i64: 32, 128>}, {pipeline_mode = #tpu.pipeline_mode<synchronous>, transform_indices = @transform_3, window_bounds = array<i64: 1, 128>}, {pipeline_mode = #tpu.pipeline_mode<synchronous>, transform_indices = @transform_4, window_bounds = array<i64: 1, 128>}, {transform_indices = @transform_5, window_bounds = array<i64: 8, 128>}]} {
    %c0 = arith.constant 0 : index
    %c0_0 = arith.constant 0 : index
    %c0_1 = arith.constant 0 : index
    %c0_2 = arith.constant 0 : index
    %0 = vector.load %arg1[%c0, %c0_0, %c0_1, %c0_2] : memref<2x2x4x32xf32, #tpu.memory_space<vmem>>, vector<2x1x4x32xf32>
    %1 = vector.shape_cast %0 : vector<2x1x4x32xf32> to vector<2x4x32xf32>
    %2 = vector.shape_cast %1 : vector<2x4x32xf32> to vector<8x32xf32>
    %c0_3 = arith.constant 0 : index
    %c1 = arith.constant 1 : index
    %c0_4 = arith.constant 0 : index
    %c0_5 = arith.constant 0 : index
    %3 = vector.load %arg1[%c0_3, %c1, %c0_4, %c0_5] : memref<2x2x4x32xf32, #tpu.memory_space<vmem>>, vector<2x1x4x32xf32>
    %4 = vector.shape_cast %3 : vector<2x1x4x32xf32> to vector<2x4x32xf32>
    %5 = vector.shape_cast %4 : vector<2x4x32xf32> to vector<8x32xf32>
    %cst = arith.constant dense<0.000000e+00> : vector<8xf32>
    %6 = vector.multi_reduction <add>, %2, %cst [1] : vector<8x32xf32> to vector<8xf32>
    %7 = vector.shape_cast %6 : vector<8xf32> to vector<8x1xf32>
    %cst_6 = arith.constant dense<0.000000e+00> : vector<8xf32>
    %8 = vector.multi_reduction <add>, %5, %cst_6 [1] : vector<8x32xf32> to vector<8xf32>
    %9 = vector.shape_cast %8 : vector<8xf32> to vector<8x1xf32>
    %10 = arith.addf %7, %9 : vector<8x1xf32>
    %11 = arith.mulf %2, %2 : vector<8x32xf32>
    %cst_7 = arith.constant dense<0.000000e+00> : vector<8xf32>
    %12 = vector.multi_reduction <add>, %11, %cst_7 [1] : vector<8x32xf32> to vector<8xf32>
    %13 = vector.shape_cast %12 : vector<8xf32> to vector<8x1xf32>
    %14 = arith.mulf %5, %5 : vector<8x32xf32>
    %cst_8 = arith.constant dense<0.000000e+00> : vector<8xf32>
    %15 = vector.multi_reduction <add>, %14, %cst_8 [1] : vector<8x32xf32> to vector<8xf32>
    %16 = vector.shape_cast %15 : vector<8xf32> to vector<8x1xf32>
    %17 = arith.addf %13, %16 : vector<8x1xf32>
    %cst_9 = arith.constant 1.562500e-02 : f32
    %18 = vector.broadcast %cst_9 : f32 to vector<8x1xf32>
    %19 = arith.mulf %10, %18 : vector<8x1xf32>
    %cst_10 = arith.constant 1.562500e-02 : f32
    %20 = vector.broadcast %cst_10 : f32 to vector<8x1xf32>
    %21 = arith.mulf %17, %20 : vector<8x1xf32>
    %22 = arith.mulf %19, %19 : vector<8x1xf32>
    %23 = arith.subf %21, %22 : vector<8x1xf32>
    %cst_11 = arith.constant 0.000000e+00 : f32
    %24 = vector.broadcast %cst_11 : f32 to vector<8x1xf32>
    %25 = arith.maximumf %23, %24 : vector<8x1xf32>
    %cst_12 = arith.constant 9.99999974E-6 : f32
    %26 = vector.broadcast %cst_12 : f32 to vector<8x1xf32>
    %27 = arith.addf %25, %26 : vector<8x1xf32>
    %28 = math.rsqrt %27 : vector<8x1xf32>
    %c0_13 = arith.constant 0 : index
    %c0_14 = arith.constant 0 : index
    %29 = vector.load %arg2[%c0_13, %c0_14] : memref<32x128xf32, #tpu.memory_space<vmem>>, vector<32x128xf32>
    %cst_15 = arith.constant dense<0.000000e+00> : vector<8x128xf32>
    %30 = tpu.matmul %2, %29, %cst_15 {dimension_numbers = #tpu.dot_dimension_numbers<[1], [0], [0], [1], [0, 0, 1, 1], [], []>} : vector<8x32xf32>, vector<32x128xf32>, vector<8x128xf32> -> vector<8x128xf32>
    %c0_16 = arith.constant 0 : index
    %c0_17 = arith.constant 0 : index
    %31 = vector.load %arg3[%c0_16, %c0_17] : memref<32x128xf32, #tpu.memory_space<vmem>>, vector<32x128xf32>
    %cst_18 = arith.constant dense<0.000000e+00> : vector<8x128xf32>
    %32 = tpu.matmul %5, %31, %cst_18 {dimension_numbers = #tpu.dot_dimension_numbers<[1], [0], [0], [1], [0, 0, 1, 1], [], []>} : vector<8x32xf32>, vector<32x128xf32>, vector<8x128xf32> -> vector<8x128xf32>
    %33 = arith.addf %30, %32 : vector<8x128xf32>
    %c0_19 = arith.constant 0 : index
    %c0_20 = arith.constant 0 : index
    %34 = vector.load %arg5[%c0_19, %c0_20] : memref<1x128xf32, #tpu.memory_space<vmem>>, vector<1x128xf32>
    %35 = vector.broadcast %19 : vector<8x1xf32> to vector<8x128xf32>
    %36 = vector.broadcast %34 : vector<1x128xf32> to vector<8x128xf32>
    %37 = arith.mulf %35, %36 : vector<8x128xf32>
    %38 = arith.subf %33, %37 : vector<8x128xf32>
    %39 = vector.broadcast %28 : vector<8x1xf32> to vector<8x128xf32>
    %40 = arith.mulf %38, %39 : vector<8x128xf32>
    %c0_21 = arith.constant 0 : index
    %c0_22 = arith.constant 0 : index
    %41 = vector.load %arg4[%c0_21, %c0_22] : memref<1x128xf32, #tpu.memory_space<vmem>>, vector<1x128xf32>
    %42 = vector.broadcast %41 : vector<1x128xf32> to vector<8x128xf32>
    %43 = arith.addf %40, %42 : vector<8x128xf32>
    %c0_23 = arith.constant 0 : index
    %c0_24 = arith.constant 0 : index
    %44 = vector.load %arg6[%c0_23, %c0_24] : memref<8x128xf32, #tpu.memory_space<vmem>>, vector<8x128xf32>
    tpu.vector_store %arg6[%c0_23, %c0_24], %43 {strides = array<i32>} : memref<8x128xf32, #tpu.memory_space<vmem>>, vector<8x128xf32>,
    return
  }
  func.func @transform_0(%arg0: i32) -> (i32, i32, i32, i32) {
    %c0_i32 = arith.constant 0 : i32
    %c0_i32_0 = arith.constant 0 : i32
    %c0_i32_1 = arith.constant 0 : i32
    %c0_i32_2 = arith.constant 0 : i32
    return %arg0, %c0_i32, %c0_i32_0, %c0_i32_1 : i32, i32, i32, i32
  }
  func.func @transform_1(%arg0: i32) -> (i32, i32) {
    %c0_i32 = arith.constant 0 : i32
    %c0_i32_0 = arith.constant 0 : i32
    %c0_i32_1 = arith.constant 0 : i32
    return %c0_i32, %c0_i32_0 : i32, i32
  }
  func.func @transform_2(%arg0: i32) -> (i32, i32) {
    %c0_i32 = arith.constant 0 : i32
    %c0_i32_0 = arith.constant 0 : i32
    %c0_i32_1 = arith.constant 0 : i32
    return %c0_i32, %c0_i32_0 : i32, i32
  }
  func.func @transform_3(%arg0: i32) -> (i32, i32) {
    %c0_i32 = arith.constant 0 : i32
    %c0_i32_0 = arith.constant 0 : i32
    %c0_i32_1 = arith.constant 0 : i32
    return %c0_i32, %c0_i32_0 : i32, i32
  }
  func.func @transform_4(%arg0: i32) -> (i32, i32) {
    %c0_i32 = arith.constant 0 : i32
    %c0_i32_0 = arith.constant 0 : i32
    %c0_i32_1 = arith.constant 0 : i32
    return %c0_i32, %c0_i32_0 : i32, i32
  }
  func.func @transform_5(%arg0: i32) -> (i32, i32) {
    %c0_i32 = arith.constant 0 : i32
    %c0_i32_0 = arith.constant 0 : i32
    return %arg0, %c0_i32 : i32, i32
  }
}

</mosaic_0001>

<bundles_post_ra>
// kernel: tpu_custom_call.1
= control target key start
LH: loop header
LB: loop body
LE: loop exit
PB: predicated region body
PF: predicated region fallthrough
CT: control target
= control target key end

     0   :  { %10 = vsyncpa [#allocation3], 0  ;;  %s975_s0 = inlined_call_operand.hbm [shape: f32[16,2,4,32], index: 0, kind: input, shape index: {}]   ;;  %s976_s1 = inlined_call_operand.hbm [shape: f32[32,128], index: 1, kind: input, shape index: {}]   ;;  %s977_s2 = inlined_call_operand.hbm [shape: f32[32,128], index: 2, kind: input, shape index: {}]   ;;  %s978_s3 = inlined_call_operand.vmem [shape: f32[1,128], index: 3, kind: input, shape index: {}]   ;;  %s979_s4 = inlined_call_operand.vmem [shape: f32[1,128], index: 4, kind: input, shape index: {}]   ;;  %s980_s5 = inlined_call_operand.hbm [shape: f32[64,128], index: 5, kind: output, shape index: {}]  }
   0x1   :  { %12 = vsyncpa [#allocation3 + $0x1], 0 }
   0x2   :  { %13 = vsyncpa [#allocation6], 0 }
   0x3   :  { %14 = vsyncpa [#allocation4], 0 }
   0x4   :  { %16 = vsyncpa [#allocation4 + $0x1], 0  ;;  %s823_s18 = smov 0   ;;  %s825_s19 = smov 0  }
   0x5   :  { %s827_s20 = smov 0   ;;  %s829_s21 = smov 0  }
   0x6 LB: > { %s844_s22 = sadd.s32 4294967295, %s785_s21   ;;  %s526_s23 = sadd.s32 4294967294, %s785_s21   ;;  %s785_s21 = sphi %s829_s21, %s989_s21   ;;  %s781_s20 = sphi %s827_s20, %s988_s20   ;;  %s777_s19 = sphi %s825_s19, %s987_s19   ;;  %s773_s18 = sphi %s823_s18, %s986_s18  }
   0x7   : > { %p42_p0 = scmp.ne.s32.totalorder %s777_s19, %s773_s18  ;;  %p43_p1 = scmp.eq.s32.totalorder %s844_s22, 0 }
   0x8   : > { %p150_p2 = scmp.eq.s32.totalorder %s844_s22, 7  ;;  %p156_p3 = scmp.eq.s32.totalorder %s526_s23, 7 }
   0x9   : > { %p853_p4 = por %p43_p1, %p42_p0  ;;  %p527_p5 = scmp.ge.s32.totalorder %s785_s21, 1 }
   0xa   : > { %p858_p6 = por %p156_p3, %p42_p0  ;;  %p163_p7 = scmp.lt.s32.totalorder %s785_s21, 9 }
   0xb   : > { %s174_s28 = sshll.u32 %s976_s1, 4  ;;  %s787_s30 = smov [#allocation5]   ;;  %s175_s28 = int_to_ptr.hbm [resolvable:$true] %s174_s28 }
   0xc   : > { %p866_p8 = pnand %p527_p5, %p163_p7  ;;  %s176_s6 = sshll.u32 %s787_s30, 4  ;;  %s177_s6 = int_to_ptr.vmem [resolvable:$true] %s176_s6 }
   0xd   : > { %s188_s9 = sshll.u32 %s977_s2, 4  ;;  %s788_s10 = smov 128   ;;  %s189_s9 = int_to_ptr.hbm [resolvable:$true] %s188_s9 }
   0xe   : > { %p562_p9 = pneg %p866_p8  ;;  %s789_s11 = smov 8  }
   0xf   : > { %s790_s12 = smov [#allocation7]   ;;  %s878_s14 = sadd.s32 1, %s785_s21  }
  0x10   : > { %p563_p10 = pnand %p562_p9, %p43_p1  ;;  %s190_s13 = sshll.u32 %s790_s12, 4  ;;  %s191_s13 = int_to_ptr.vmem [resolvable:$true] %s190_s13 }
  0x11   : > { %s29_s15 = sadd.s32 1, %s781_s20  ;;  %s26_s16 = ssub.s32 %s785_s21, %s878_s14 }
  0x12   : > { %565 = dma.hbm_to_vmem [thread:$0]  (!%p563_p10), %s175_s28, 512, %s177_s6, [#allocation6], %s788_s10, %s788_s10, %s789_s11  }
  0x13   : > { %568 = dma.hbm_to_vmem [thread:$0]  (!%p563_p10), %s189_s9, 512, %s191_s13, [#allocation6], %s788_s10, %s788_s10, %s789_s11  }
  0x14   : > { %p36_p11 = scmp.ne.s32.totalorder %s781_s20, %s777_s19  ;;  %p27_p12 = scmp.eq.s32.totalorder %s26_s16, 0 }
  0x15   : > { %p37_p13 = scmp.eq.s32.totalorder %s785_s21, 0  ;;  %p579_p3 = scmp.lt.s32.totalorder %s785_s21, 8 }
  0x16   : > { %p888_p0 = por %p150_p2, %p36_p11  ;;  %s210_s26 = sand.u32 1, %s781_s20  }
  0x17   : > { %s894_s23 = scalar_select %p27_p12, %s781_s20, %s29_s15  }
  0x18   : > { %p38_p5 = por %p37_p13, %p36_p11  ;;  %s531_s27 = sshll.u32 %s210_s26, 4 }
  0x19   : > { %s549_s28 = sshll.u32 %s785_s21, 4  ;;  %s214_s8 = scalar_lea.vmem [#allocation2], %s531_s27 }
  0x1a   : > { %s220_s7 = scalar_lea.hbm %s975_s0, %s549_s28  ;;  %s223_s9 = sshll.u32 %s214_s8, 4  ;;  %s224_s9 = int_to_ptr.vmem [resolvable:$true] %s223_s9 }
  0x1b   : > { %s221_s10 = sshll.u32 %s220_s7, 4  ;;  %p901_p2 = pnand %p579_p3, %p38_p5  ;;  %s222_s10 = int_to_ptr.hbm [resolvable:$true] %s221_s10 }
  0x1c   : > { %s211_s12 = scalar_lea.sflag [#allocation3], %s210_s26  ;;  %s685_s13 = sshra.s32 %s222_s10, 4  ;;  %s686_s13 = int_to_ptr.hbm [resolvable:$true] %s685_s13 }
  0x1d   : > { %s687_s15 = scalar_lea.hbm %s686_s13, 16  ;;  %p689_p9 = pneg %p901_p2 }
  0x1e   : > { %p688_p7 = scmp.ne.s32.totalorder %s686_s13, %s687_s15  ;;  %s692_s28 = scalar_lea.hbm %s975_s0, 128 }
  0x1f   : > { %p693_p12 = scmp.lt.s32.totalorder %s686_s13, %s975_s0  ;;  %p694_p13 = scmp.lt.s32.totalorder %s692_s28, %s687_s15 }
  0x20   : > { %p690_p10 = pnand %p689_p9, %p688_p7 }
  0x21   : > { %p695_p3 = por %p694_p13, %p693_p12 }
  0x22   : > { %p691_p11 = pneg %p690_p10 }
  0x24   : > { %p696_p5 = pnand %p695_p3, %p691_p11 }
  0x26   : > { %699 = shalt.err (!%p696_p5)
}
  0x27   : > { %s791_s26 = smov 64   ;;  %s792_s7 = smov 4  }
  0x28   : > { %572 = dma.hbm_to_vmem [thread:$0]  (!%p901_p2), %s222_s10, 256, %s224_s9, %s211_s12, %s791_s26, %s791_s26, %s792_s7  }
  0x29   : > { %235 = sbr.rel (%p866_p8) target bundleno = 241 (0xf1), region = 40  ;;  %s918_s8 = sand.u32 (!%p866_p8), 1, %s777_s19  }
  0x2a   : > { %s536_s16 = sshll.u32 (!%p866_p8), %s918_s8, 4  ;;  %s238_s13 = scalar_lea.sflag (!%p866_p8), [#allocation3], %s918_s8 }
  0x2b   : > { %s241_s15 = scalar_lea.vmem (!%p866_p8), [#allocation2], %s536_s16 }
  0x2e   : > { %760 = dma.done.wait (%p853_p4), %s238_s13, 256  }
  0x2f   : > { %762 = vsyncadd (%p853_p4), %s238_s13, 4294967040 }
  0x30   : > { %764 = dma.done.wait (%p43_p1), [#allocation6], 1024  }
  0x31   : > { %766 = vsyncadd (%p43_p1), [#allocation6], 4294966272  ;;  %v280_v0 = vld [vmem:[%s241_s15] sm:$0xf]  ;;  %v281_v1 = vld [vmem:[%s241_s15 + $0x8] sm:$0xf] }
  0x32   : > { %287 = vst [vmem:[#allocation1] ss:$2 sm:$0xff] %v280_v0  ;;  %v355_v2 = vld [vmem:[#allocation7 + $0x18] sm:$0xff]  ;;  %v354_v4 = vld [vmem:[#allocation7 + $0x10] sm:$0xff]  ;;  %vm292_vm0 = vcmask 261120   ;;  %v353_v8 = vld [vmem:[#allocation7 + $0x8] sm:$0xff]  ;;  %v307_v14 = vmul.f32 %v280_v0, %v280_v0  ;;  %v308_v15 = vmul.f32 %v281_v1, %v281_v1 }
  0x33   : > { %289 = vst [vmem:[#allocation1 + $0x1] ss:$2 sm:$0xff] %v281_v1  ;;  %v351_v3 = vld [vmem:[#allocation5 + $0x18] sm:$0xff]  ;;  %v540_v5 = vld [vmem:[%s241_s15 + $0x4] sm:$0xf]  ;;  %374 = vmatpush.msra.mxu0 %v355_v2  ;;  %v349_v10 = vld [vmem:[#allocation5 + $0x8] sm:$0xff] }
  0x34   : > { %400 = vmatpush.msra.mxu1 %v351_v3  ;;  %v350_v6 = vld [vmem:[#allocation5 + $0x10] sm:$0xff]  ;;  %v541_v7 = vld [vmem:[%s241_s15 + $0xc] sm:$0xf]  ;;  %v352_v12 = vld [vmem:[#allocation7] sm:$0xff]  ;;  %v319_v18 = vmul.f32 %v540_v5, %v540_v5  ;;  %s539_s9 = sshll.u32 %s918_s8, 3  ;;  %s545_s10 = sshll.u32 %s844_s22, 3 }
  0x35   : > { %375 = vmatpush.msra.mxu0 %v354_v4  ;;  %v348_v13 = vld [vmem:[#allocation5] sm:$0xff]  ;;  %v320_v19 = vmul.f32 %v541_v7, %v541_v7  ;;  %v621_v42 = vld [vmem:[%s979_s4] ss:$0 sm:$0xff]  ;;  %s432_s27 = scalar_lea.hbm %s980_s5, %s545_s10  ;;  %s278_s6 = scalar_lea.vmem [#allocation8], %s539_s9 }
  0x36   : > { %401 = vmatpush.msra.mxu1 %v350_v6  ;;  %v622_v51 = vld [vmem:[%s978_s3] ss:$0 sm:$0xff]  ;;  %s434_s22 = sshll.u32 %s278_s6, 4  ;;  %s436_s26 = sshll.u32 %s432_s27, 4  ;;  %s435_s22 = int_to_ptr.vmem [resolvable:$true] %s434_s22  ;;  %s437_s26 = int_to_ptr.hbm [resolvable:$true] %s436_s26 }
  0x37   : > { %376 = vmatpush.msra.mxu0 %v353_v8  ;;  %s422_s7 = scalar_lea.sflag [#allocation4], %s918_s8  ;;  %s729_s16 = sshra.s32 %s437_s26, 4  ;;  %s730_s16 = int_to_ptr.hbm [resolvable:$true] %s729_s16 }
  0x38   : > { %402 = vmatpush.msra.mxu1 %v349_v10  ;;  %s731_s13 = scalar_lea.hbm %s730_s16, 8  ;;  %s735_s29 = scalar_lea.hbm %s980_s5, 64 }
  0x39   : > { %377 = vmatpush.msra.mxu0 %v352_v12  ;;  %p732_p1 = scmp.ne.s32.totalorder %s730_s16, %s731_s13  ;;  %p736_p2 = scmp.lt.s32.totalorder %s730_s16, %s980_s5 }
  0x3a   : > { %v290_v9 = vld.sshfl [vmem:[#allocation1] sm:$0xff pattern:$0x75316420]  ;;  %403 = vmatpush.msra.mxu1 %v348_v13  ;;  %p737_p7 = scmp.lt.s32.totalorder %s735_s29, %s731_s13 }
  0x3b   : > { %v293_v11 = vsel %vm292_vm0, %v290_v9, 0.0  ;;  %298 = vst [vmem:[#allocation1] ss:$2 sm:$0xff] %v540_v5  ;;  %p733_p4 = pnand %p732_p1, %p888_p0 }
  0x3c   : > { %294 = vadd.xlane.f32.xlu0 %v293_v11  ;;  %300 = vst [vmem:[#allocation1 + $0x1] ss:$2 sm:$0xff] %v541_v7  ;;  %p738_p9 = por %p737_p7, %p736_p2 }
  0x3d   : > { %p734_p8 = pneg %p733_p4 }
  0x3f   : > { %p739_p10 = pnand %p738_p9, %p734_p8 }
  0x43   : > { %v301_v16 = vld.sshfl [vmem:[#allocation1] sm:$0xff pattern:$0x75316420] }
  0x44   : > { %v303_v17 = vsel %vm292_vm0, %v301_v16, 0.0  ;;  %311 = vst [vmem:[#allocation1] ss:$2 sm:$0xff] %v307_v14 }
  0x45   : > { %304 = vadd.xlane.f32.xlu0 %v303_v17  ;;  %313 = vst [vmem:[#allocation1 + $0x1] ss:$2 sm:$0xff] %v308_v15 }
  0x4c   : > { %v314_v20 = vld.sshfl [vmem:[#allocation1] sm:$0xff pattern:$0x75316420] }
  0x4d   : > { %v316_v21 = vsel %vm292_vm0, %v314_v20, 0.0  ;;  %323 = vst [vmem:[#allocation1] ss:$2 sm:$0xff] %v319_v18 }
  0x4e   : > { %325 = vst [vmem:[#allocation1 + $0x1] ss:$2 sm:$0xff] %v320_v19  ;;  %317 = vadd.xlane.f32.xlu1 %v316_v21 }
  0x55   : > { %v326_v22 = vld.sshfl [vmem:[#allocation1] sm:$0xff pattern:$0x75316420] }
  0x56   : > { %v328_v23 = vsel %vm292_vm0, %v326_v22, 0.0  ;;  %356 = vst [vmem:[#allocation1] ss:$2 sm:$0xff] %v540_v5 }
  0x57   : > { %358 = vst [vmem:[#allocation1 + $0x1] ss:$2 sm:$0xff] %v541_v7  ;;  %329 = vadd.xlane.f32.xlu1 %v328_v23 }
  0x5e   : > { %v359_v24 = vld.sshfl [vmem:[#allocation1] sm:$0xff pattern:$0x75316420] }
  0x5f   : > { %542 = vmatmul.msk.f32.vlgmr.msra.gmra.mxu0 %vm292_vm0, %v359_v24  ;;  %382 = vst [vmem:[#allocation1] ss:$2 sm:$0xff] %v280_v0 }
  0x60   : > { %384 = vst [vmem:[#allocation1 + $0x1] ss:$2 sm:$0xff] %v281_v1 }
  0x67   : > { %v385_v25 = vld.sshfl [vmem:[#allocation1] sm:$0xff pattern:$0x75316420] }
  0x68   : > { %543 = vmatmul.msk.f32.vlgmr.msra.gmra.mxu1 %vm292_vm0, %v385_v25 }
  0xaf   : > { %v295_v26 = vpop.xlane.xlu0 %294 }
  0xb8   : > { %v305_v28 = vpop.xlane.xlu0 %304 }
  0xb9   : > { %v306_v29 = vadd.f32 %v305_v28, %v295_v26 }
  0xbb   : > { %v332_v30 = vmul.f32 0.015625, %v306_v29 }
  0xbd   : > { %v334_v33 = vmul.f32 %v332_v30, %v332_v30  ;;  %v412_v47 = vmul.f32 %v621_v42, %v332_v30 }
  0xc1   : > { %v318_v27 = vpop.xlane.xlu1 %317 }
  0xca   : > { %v330_v31 = vpop.xlane.xlu1 %329 }
  0xcb   : > { %v331_v32 = vadd.f32 %v330_v31, %v318_v27 }
  0xcd   : > { %v333_v34 = vmul.f32 0.015625, %v331_v32 }
  0xcf   : > { %v335_v35 = vsub.f32 %v333_v34, %v334_v33 }
  0xd1   : > { %v336_v36 = vmax.f32 %v335_v35, 0.0 }
  0xd3   : > { %v337_v37 = vadd.f32 1e-05, %v336_v36 }
  0xd5   : > { %623 = vrsqrt.f32 %v337_v37  ;;  %vm344_vm2 = vweird.f32 %v337_v37 }
  0xdb   : > { %v624_v38 = vpop.eup %623 }
  0xdc   : > { %v339_v39 = vmul.f32 %v624_v38, %v337_v37  ;;  %v379_v44 = vpop.f32.mrf.mxu0  ;;  %vm345_vm1 = vweird.f32 %v624_v38 }
  0xdd   : > { %vm346_vm3 = vmor %vm344_vm2, %vm345_vm1 }
  0xde   : > { %v340_v40 = vmul.f32 %v624_v38, %v339_v39 }
  0xe0   : > { %v341_v41 = vmul.f32 0.5, %v340_v40 }
  0xe2   : > { %v342_v43 = vsub.f32 1.5, %v341_v41 }
  0xe4   : > { %v343_v45 = vmul.f32 %v624_v38, %v342_v43 }
  0xe5   : > { %v405_v46 = vpop.f32.mrf.mxu1 }
  0xe6   : > { %v406_v48 = vadd.f32 %v405_v46, %v379_v44  ;;  %v347_v49 = vsel %vm346_vm3, %v624_v38, %v343_v45 }
  0xe8   : > { %v413_v50 = vsub.f32 %v406_v48, %v412_v47 }
  0xea   : > { %v414_v52 = vmul.f32 %v413_v50, %v347_v49 }
  0xec   : > { %v419_v53 = vadd.f32 %v622_v51, %v414_v52 }
  0xee   : > { %420 = vst [vmem:[%s278_s6] sm:$0xff] %v419_v53 }
  0xef   : > { %742 = shalt.err (!%p739_p10)
}
  0xf0   : > { %560 = dma.vmem_to_hbm [thread:$0]  (%p888_p0), %s435_s22, 128, %s437_s26, %s422_s7  }
  0xf1 PF: > { %p582_p11 = scmp.ge.s32.totalorder %s785_s21, 2  ;;  %s448_s8 = sand.u32 1, %s773_s18  }
  0xf2   : > { %s449_s11 = scalar_lea.sflag [#allocation4], %s448_s8 }
  0xf3   : > { %p574_p12 = pnand %p582_p11, %p858_p6 }
  0xf5   : > { %p575_p13 = pneg %p574_p12 }
  0xf7   : > { %768 = dma.done.wait (%p575_p13), %s449_s11, 128  }
  0xf8   : > { %770 = vsyncadd (%p575_p13), %s449_s11, 4294967168  ;;  %p19_p3 = scmp.ge.s32.totalorder %s878_s14, 10   ;;  %s986_s18 = smov %s777_s19 }
  0xf9   : > { %s987_s19 = smov %s781_s20  ;;  %s988_s20 = smov %s894_s23 }
  0xfa   : > { %s989_s21 = smov %s878_s14  ;;  %21 = sbr.rel (!%p19_p3) target bundleno = 6 (0x6), region = 100 }
  0xff   :  { %455 = vsyncpa [#allocation3], 1 }
 0x100   :  { %457 = vsyncpa [#allocation3 + $0x1], 1 }
 0x101   :  { %458 = vsyncpa [#allocation6], 1 }
 0x102   :  { %459 = vsyncpa [#allocation4], 1 }
 0x103   :  { %461 = vsyncpa [#allocation4 + $0x1], 1 }

</bundles_post_ra>
